<compile_context>
chip_gen: v6e
topology: v6e:2x2x1
jax: 0.10.0
libtpu: 0.0.40
codegen_flags: <defaults>
</compile_context>

<pallas_src>
import math

import jax
import jax.numpy as jnp
from jax.experimental import pallas as pl
from jax.experimental.pallas import tpu as pltpu

ALPHA = 0.25
GAMMA = 2.0          # compile-time constant -> modulating factor is a square
EPS = 1e-08
_LOG_EPS = math.log(EPS)
_LOG_1M_EPS = math.log1p(-EPS)


def _make_kernel(total_rows: int, block_rows: int):
    """Build the per-tile kernel; closes over the TRUE row count for the mean."""
    inv_rows = 1.0 / float(total_rows)
    needs_mask = (total_rows % block_rows) != 0

    def kernel(x_ref, t_ref, out_ref, acc_ref):
        i = pl.program_id(0)

        @pl.when(i == 0)
        def _():
            acc_ref[...] = jnp.zeros_like(acc_ref)

        # Upcast inside the kernel (inputs may arrive narrow through the DMA;
        # no wrapper-side f32 copies / extra HBM passes).
        x = x_ref[...].astype(jnp.float32)
        t = t_ref[...].astype(jnp.float32)

        # BCE-from-logits via log-sigmoid identities:
        #   e = exp(-x); sigmoid = 1/(1+e); log(sigmoid) = -log1p(e);
        #   log(1 - sigmoid) = -x - log1p(e)
        # -> 3 EUP ops/element instead of ~6 (sigmoid, 2x log, pow=exp+log).
        e = jnp.exp(-x)
        y = 1.0 / (1.0 + e)            # sigmoid(x)
        log_y = -jnp.log1p(e)          # log(sigmoid(x))
        log_1my = log_y - x            # log(1 - sigmoid(x))

        # Preserve the reference clamp(eps, 1-eps) semantics with cheap VALU clips.
        log_y = jnp.clip(log_y, _LOG_EPS, _LOG_1M_EPS)
        log_1my = jnp.clip(log_1my, _LOG_EPS, _LOG_1M_EPS)
        y = jnp.clip(y, EPS, 1.0 - EPS)

        bce = -(t * log_y + (1.0 - t) * log_1my)
        p_t = t * y + (1.0 - t) * (1.0 - y)
        alpha_factor = t * ALPHA + (1.0 - t) * (1.0 - ALPHA)
        one_m_pt = 1.0 - p_t
        modulating = one_m_pt * one_m_pt          # gamma == 2.0 -> square (VALU)

        loss = alpha_factor * modulating * bce    # (TB, C)

        if needs_mask:
            # Zero padding rows of a ragged last tile so they don't contribute.
            row = jax.lax.broadcasted_iota(jnp.int32, (loss.shape[0], 1), 0)
            row = row + i * block_rows
            loss = jnp.where(row < total_rows, loss, 0.0)

        # Single fused full-tile reduction accumulated across grid steps.
        acc_ref[...] += jnp.sum(loss)

        @pl.when(i == pl.num_programs(0) - 1)
        def _():
            # mean over rows of per-row sums == total_sum / B  (TRUE B, not tile size)
            out_ref[...] = acc_ref[...] * inv_rows

    return kernel


def focal_loss_tpu(logits: jax.Array, target: jax.Array, *, block_rows=None):
    """Scalar: mean over rows of sum_{last axis}(focal loss(sigmoid(logits), target))."""
    assert logits.shape == target.shape and logits.ndim == 2
    B, C = logits.shape

    if block_rows is None:
        # Sized so 2 inputs x 2 pipeline buffers x TB x C x 4B stays well under
        # v7x's 32 MiB scoped-VMEM default (also fine on v5e/v6e for typical C).
        block_rows = min(512, B)
    if block_rows >= B:
        block_rows = B
    else:
        block_rows = max(8, (block_rows // 8) * 8)   # sublane (8) alignment

    grid = (pl.cdiv(B, block_rows),)
    kernel = _make_kernel(B, block_rows)

    out = pl.pallas_call(
        kernel,
        out_shape=jax.ShapeDtypeStruct((1, 1), jnp.float32),
        grid_spec=pltpu.PrefetchScalarGridSpec(
            num_scalar_prefetch=0,
            grid=grid,
            in_specs=[
                pl.BlockSpec((block_rows, C), lambda i: (i, 0)),
                pl.BlockSpec((block_rows, C), lambda i: (i, 0)),
            ],
            out_specs=pl.BlockSpec((1, 1), lambda i: (0, 0)),
            scratch_shapes=[pltpu.VMEM((1, 1), jnp.float32)],
        ),
        compiler_params=pltpu.CompilerParams(
            # output block is resident / accumulated across this axis
            dimension_semantics=("arbitrary",),
        ),
    )(logits, target)
    return out[0, 0]


def _focal_loss_ref(logits, target):
    # Faithful to the PyTorch module: sigmoid -> clamp(eps, 1-eps) -> BCE -> focal.
    y = jax.nn.sigmoid(logits.astype(jnp.float32))
    y = jnp.clip(y, EPS, 1.0 - EPS)
    t = target.astype(jnp.float32)
    bce = -(t * jnp.log(y) + (1.0 - t) * jnp.log(1.0 - y))
    p_t = t * y + (1.0 - t) * (1.0 - y)
    alpha_factor = t * ALPHA + (1.0 - t) * (1.0 - ALPHA)
    mod = jnp.power(1.0 - p_t, GAMMA)
    loss = alpha_factor * mod * bce
    return jnp.mean(jnp.sum(loss, axis=-1))


if __name__ == "__main__":
    key = jax.random.PRNGKey(0)
    k1, k2 = jax.random.split(key)
    B, C = 16, 128
    logits = jax.random.normal(k1, (B, C), dtype=jnp.float32)
    target = (jax.random.uniform(k2, (B, C)) > 0.5).astype(jnp.float32)

    # block_rows=8 exercises the multi-tile grid + accumulator path (grid = 2).
    out = focal_loss_tpu(logits, target, block_rows=8)
    out = jax.block_until_ready(out)

    ref = _focal_loss_ref(logits, target)
    assert jnp.allclose(out, ref, rtol=1e-5, atol=1e-5), (out, ref)
    print("KERNEL_OK")
</pallas_src>

<mosaic_0001>
module attributes {stable_mosaic.version = 11 : i64} {
  func.func @kernel(%arg0: i32, %arg1: memref<8x128xf32, #tpu.memory_space<vmem>>, %arg2: memref<8x128xf32, #tpu.memory_space<vmem>>, %arg3: memref<1x1xf32, #tpu.memory_space<vmem>>, %arg4: memref<1x1xf32, #tpu.memory_space<vmem>>) attributes {dimension_semantics = [#tpu.dimension_semantics<arbitrary>], iteration_bounds = array<i64: 2>, scalar_prefetch = 0 : i64, scratch_operands = 1 : i64, tpu.core_type = #tpu.core_type<tc>, window_params = [{transform_indices = @transform_0, window_bounds = array<i64: 8, 128>}, {transform_indices = @transform_1, window_bounds = array<i64: 8, 128>}, {pipeline_mode = #tpu.pipeline_mode<synchronous>, transform_indices = @transform_2, window_bounds = array<i64: 1, 1>}]} {
    %c0_i32 = arith.constant 0 : i32
    %0 = arith.cmpi eq, %arg0, %c0_i32 : i32
    %1 = arith.extui %0 : i1 to i32
    %c0_i32_0 = arith.constant 0 : i32
    %2 = arith.cmpi ne, %1, %c0_i32_0 : i32
    scf.if %2 {
      %cst_27 = arith.constant 0.000000e+00 : f32
      %65 = vector.broadcast %cst_27 : f32 to vector<1x1xf32>
      %c0_28 = arith.constant 0 : index
      %c0_29 = arith.constant 0 : index
      %66 = vector.load %arg4[%c0_28, %c0_29] : memref<1x1xf32, #tpu.memory_space<vmem>>, vector<1x1xf32>
      tpu.vector_store %arg4[%c0_28, %c0_29], %65 {strides = array<i32>} : memref<1x1xf32, #tpu.memory_space<vmem>>, vector<1x1xf32>,
    } else {
    }
    %c0 = arith.constant 0 : index
    %c0_1 = arith.constant 0 : index
    %3 = vector.load %arg1[%c0, %c0_1] : memref<8x128xf32, #tpu.memory_space<vmem>>, vector<8x128xf32>
    %c0_2 = arith.constant 0 : index
    %c0_3 = arith.constant 0 : index
    %4 = vector.load %arg2[%c0_2, %c0_3] : memref<8x128xf32, #tpu.memory_space<vmem>>, vector<8x128xf32>
    %cst = arith.constant 0.000000e+00 : f32
    %5 = vector.broadcast %cst : f32 to vector<8x128xf32>
    %6 = arith.subf %5, %3 : vector<8x128xf32>
    %7 = math.exp %6 : vector<8x128xf32>
    %cst_4 = arith.constant 1.000000e+00 : f32
    %8 = vector.broadcast %cst_4 : f32 to vector<8x128xf32>
    %9 = arith.addf %8, %7 : vector<8x128xf32>
    %cst_5 = arith.constant 1.000000e+00 : f32
    %10 = vector.broadcast %cst_5 : f32 to vector<8x128xf32>
    %11 = arith.divf %10, %9 : vector<8x128xf32>
    %12 = math.log1p %7 : vector<8x128xf32>
    %cst_6 = arith.constant 0.000000e+00 : f32
    %13 = vector.broadcast %cst_6 : f32 to vector<8x128xf32>
    %14 = arith.subf %13, %12 : vector<8x128xf32>
    %15 = arith.subf %14, %3 : vector<8x128xf32>
    %cst_7 = arith.constant -18.420681 : f32
    %cst_8 = arith.constant -9.99999993E-9 : f32
    %16 = vector.broadcast %cst_7 : f32 to vector<8x128xf32>
    %17 = arith.maximumf %16, %14 : vector<8x128xf32>
    %18 = vector.broadcast %cst_8 : f32 to vector<8x128xf32>
    %19 = arith.minimumf %18, %17 : vector<8x128xf32>
    %cst_9 = arith.constant -18.420681 : f32
    %cst_10 = arith.constant -9.99999993E-9 : f32
    %20 = vector.broadcast %cst_9 : f32 to vector<8x128xf32>
    %21 = arith.maximumf %20, %15 : vector<8x128xf32>
    %22 = vector.broadcast %cst_10 : f32 to vector<8x128xf32>
    %23 = arith.minimumf %22, %21 : vector<8x128xf32>
    %cst_11 = arith.constant 9.99999993E-9 : f32
    %cst_12 = arith.constant 1.000000e+00 : f32
    %24 = vector.broadcast %cst_11 : f32 to vector<8x128xf32>
    %25 = arith.maximumf %24, %11 : vector<8x128xf32>
    %26 = vector.broadcast %cst_12 : f32 to vector<8x128xf32>
    %27 = arith.minimumf %26, %25 : vector<8x128xf32>
    %28 = arith.mulf %4, %19 : vector<8x128xf32>
    %cst_13 = arith.constant 1.000000e+00 : f32
    %29 = vector.broadcast %cst_13 : f32 to vector<8x128xf32>
    %30 = arith.subf %29, %4 : vector<8x128xf32>
    %31 = arith.mulf %30, %23 : vector<8x128xf32>
    %32 = arith.addf %28, %31 : vector<8x128xf32>
    %cst_14 = arith.constant 0.000000e+00 : f32
    %33 = vector.broadcast %cst_14 : f32 to vector<8x128xf32>
    %34 = arith.subf %33, %32 : vector<8x128xf32>
    %35 = arith.mulf %4, %27 : vector<8x128xf32>
    %cst_15 = arith.constant 1.000000e+00 : f32
    %36 = vector.broadcast %cst_15 : f32 to vector<8x128xf32>
    %37 = arith.subf %36, %4 : vector<8x128xf32>
    %cst_16 = arith.constant 1.000000e+00 : f32
    %38 = vector.broadcast %cst_16 : f32 to vector<8x128xf32>
    %39 = arith.subf %38, %27 : vector<8x128xf32>
    %40 = arith.mulf %37, %39 : vector<8x128xf32>
    %41 = arith.addf %35, %40 : vector<8x128xf32>
    %cst_17 = arith.constant 2.500000e-01 : f32
    %42 = vector.broadcast %cst_17 : f32 to vector<8x128xf32>
    %43 = arith.mulf %4, %42 : vector<8x128xf32>
    %cst_18 = arith.constant 1.000000e+00 : f32
    %44 = vector.broadcast %cst_18 : f32 to vector<8x128xf32>
    %45 = arith.subf %44, %4 : vector<8x128xf32>
    %cst_19 = arith.constant 7.500000e-01 : f32
    %46 = vector.broadcast %cst_19 : f32 to vector<8x128xf32>
    %47 = arith.mulf %45, %46 : vector<8x128xf32>
    %48 = arith.addf %43, %47 : vector<8x128xf32>
    %cst_20 = arith.constant 1.000000e+00 : f32
    %49 = vector.broadcast %cst_20 : f32 to vector<8x128xf32>
    %50 = arith.subf %49, %41 : vector<8x128xf32>
    %51 = arith.mulf %50, %50 : vector<8x128xf32>
    %52 = arith.mulf %48, %51 : vector<8x128xf32>
    %53 = arith.mulf %52, %34 : vector<8x128xf32>
    %c0_21 = arith.constant 0 : index
    %c0_22 = arith.constant 0 : index
    %54 = vector.load %arg4[%c0_21, %c0_22] : memref<1x1xf32, #tpu.memory_space<vmem>>, vector<1x1xf32>
    %55 = vector.shape_cast %53 : vector<8x128xf32> to vector<1x8x128xf32>
    %cst_23 = arith.constant dense<0.000000e+00> : vector<1xf32>
    %56 = vector.multi_reduction <add>, %55, %cst_23 [1, 2] : vector<1x8x128xf32> to vector<1xf32>
    %57 = vector.shape_cast %56 : vector<1xf32> to vector<1x1x1xf32>
    %58 = vector.extract %57[0, 0, 0] : f32 from vector<1x1x1xf32>
    %59 = vector.broadcast %58 : f32 to vector<1x1xf32>
    %60 = arith.addf %54, %59 : vector<1x1xf32>
    %c0_24 = arith.constant 0 : index
    %c0_25 = arith.constant 0 : index
    %61 = vector.load %arg4[%c0_24, %c0_25] : memref<1x1xf32, #tpu.memory_space<vmem>>, vector<1x1xf32>
    tpu.vector_store %arg4[%c0_24, %c0_25], %60 {strides = array<i32>} : memref<1x1xf32, #tpu.memory_space<vmem>>, vector<1x1xf32>,
    %c1_i32 = arith.constant 1 : i32
    %62 = arith.cmpi eq, %arg0, %c1_i32 : i32
    %63 = arith.extui %62 : i1 to i32
    %c0_i32_26 = arith.constant 0 : i32
    %64 = arith.cmpi ne, %63, %c0_i32_26 : i32
    scf.if %64 {
      %c0_27 = arith.constant 0 : index
      %c0_28 = arith.constant 0 : index
      %65 = vector.load %arg4[%c0_27, %c0_28] : memref<1x1xf32, #tpu.memory_space<vmem>>, vector<1x1xf32>
      %cst_29 = arith.constant 6.250000e-02 : f32
      %66 = vector.broadcast %cst_29 : f32 to vector<1x1xf32>
      %67 = arith.mulf %65, %66 : vector<1x1xf32>
      %c0_30 = arith.constant 0 : index
      %c0_31 = arith.constant 0 : index
      %68 = vector.load %arg3[%c0_30, %c0_31] : memref<1x1xf32, #tpu.memory_space<vmem>>, vector<1x1xf32>
      tpu.vector_store %arg3[%c0_30, %c0_31], %67 {strides = array<i32>} : memref<1x1xf32, #tpu.memory_space<vmem>>, vector<1x1xf32>,
    } else {
    }
    return
  }
  func.func @transform_0(%arg0: i32) -> (i32, i32) {
    %c0_i32 = arith.constant 0 : i32
    %c0_i32_0 = arith.constant 0 : i32
    return %arg0, %c0_i32 : i32, i32
  }
  func.func @transform_1(%arg0: i32) -> (i32, i32) {
    %c0_i32 = arith.constant 0 : i32
    %c0_i32_0 = arith.constant 0 : i32
    return %arg0, %c0_i32 : i32, i32
  }
  func.func @transform_2(%arg0: i32) -> (i32, i32) {
    %c0_i32 = arith.constant 0 : i32
    %c0_i32_0 = arith.constant 0 : i32
    %c0_i32_1 = arith.constant 0 : i32
    return %c0_i32, %c0_i32_0 : i32, i32
  }
}

</mosaic_0001>

<bundles_post_ra>
// kernel: tpu_custom_call.1
= control target key start
LH: loop header
LB: loop body
LE: loop exit
PB: predicated region body
PF: predicated region fallthrough
CT: control target
= control target key end

     0   :  { %7 = vsyncpa [#allocation4], 0  ;;  %s712_s0 = inlined_call_operand.hbm [shape: f32[16,128], index: 0, kind: input, shape index: {}]   ;;  %s713_s1 = inlined_call_operand.hbm [shape: f32[16,128], index: 1, kind: input, shape index: {}]   ;;  %s714_s2 = inlined_call_operand.hbm [shape: f32[1,1], index: 2, kind: output, shape index: {}]  }
   0x1   :  { %9 = vsyncpa [#allocation4 + $0x1], 0 }
   0x2   :  { %10 = vsyncpa [#allocation7], 0 }
   0x3   :  { %12 = vsyncpa [#allocation7 + $0x1], 0 }
   0x4   :  { %13 = vsyncpa [#allocation5], 0  ;;  %s551_s9 = smov 0   ;;  %s553_s10 = smov 0  }
   0x5   :  { %s555_s11 = smov 0   ;;  %s557_s12 = smov 0  }
   0x6 LB: > { %s570_s13 = sadd.s32 4294967295, %s530_s12   ;;  %s573_s14 = sadd.s32 1, %s530_s12   ;;  %s530_s12 = sphi %s557_s12, %s726_s12   ;;  %s526_s11 = sphi %s555_s11, %s725_s11   ;;  %s522_s10 = sphi %s553_s10, %s724_s10   ;;  %s518_s9 = sphi %s551_s9, %s723_s9  }
   0x7   : > { %s23_s15 = ssub.s32 %s530_s12, %s573_s14  ;;  %s26_s16 = sadd.s32 1, %s526_s11 }
   0x8   : > { %p24_p0 = scmp.eq.s32.totalorder %s23_s15, 0  ;;  %p33_p1 = scmp.ne.s32.totalorder %s526_s11, %s522_s10 }
   0x9   : > { %p34_p2 = scmp.eq.s32.totalorder %s530_s12, 0  ;;  %p39_p3 = scmp.ne.s32.totalorder %s522_s10, %s518_s9 }
   0xa   : > { %s583_s17 = scalar_select %p24_p0, %s526_s11, %s26_s16  }
   0xb   : > { %p35_p4 = por %p34_p2, %p33_p1  ;;  %p40_p5 = scmp.eq.s32.totalorder %s570_s13, 0 }
   0xc   : > { %p365_p6 = scmp.lt.s32.totalorder %s530_s12, 2  ;;  %s592_s19 = sand.u32 1, %s526_s11  }
   0xd   : > { %p587_p7 = por %p40_p5, %p39_p3  ;;  %s335_s20 = sshll.u32 %s592_s19, 3 }
   0xe   : > { %s336_s21 = sshll.u32 %s530_s12, 7  ;;  %s114_s25 = scalar_lea.vmem [#allocation3], %s335_s20 }
   0xf   : > { %s716_s18 = scalar_select %p587_p7, 1, 0 }
  0x10   : > { %s601_s24 = scalar_lea.hbm %s712_s0, %s336_s21  ;;  %s121_s26 = sshll.u32 %s114_s25, 4  ;;  %s605_s26 = int_to_ptr.vmem [resolvable:$true] %s121_s26 }
  0x11   : > { %p607_p8 = pnand %p365_p6, %p35_p4  ;;  %s111_s28 = scalar_lea.sflag [#allocation4], %s592_s19 }
  0x12   : > { %s408_s29 = scalar_lea.hbm %s601_s24, 128  ;;  %s413_s4 = scalar_lea.hbm %s712_s0, 256 }
  0x13   : > { %p409_p11 = scmp.ne.s32.totalorder %s601_s24, %s408_s29  ;;  %p410_p12 = pneg %p607_p8 }
  0x14   : > { %p414_p1 = scmp.lt.s32.totalorder %s601_s24, %s712_s0  ;;  %p415_p2 = scmp.lt.s32.totalorder %s413_s4, %s408_s29 }
  0x15   : > { %p411_p13 = pnand %p410_p12, %p409_p11 }
  0x16   : > { %p416_p3 = por %p415_p2, %p414_p1 }
  0x17   : > { %p412_p0 = pneg %p411_p13 }
  0x19   : > { %p417_p4 = pnand %p416_p3, %p412_p0 }
  0x1b   : > { %420 = shalt.err (!%p417_p4)
}
  0x1c   : > { %s421_s7 = scalar_lea.vmem %s605_s26, 128  ;;  %s532_s8 = smov [#allocation3]  }
  0x1d   : > { %p422_p5 = scmp.ne.s32.totalorder %s605_s26, %s421_s7  ;;  %s426_s9 = sshll.u32 %s532_s8, 4  ;;  %s427_s9 = int_to_ptr.vmem [resolvable:$false] %s426_s9 }
  0x1e   : > { %s428_s15 = scalar_lea.vmem %s427_s9, 256  ;;  %p429_p13 = scmp.lt.s32.totalorder %s605_s26, %s427_s9 }
  0x1f   : > { %p424_p6 = pnand %p422_p5, %p410_p12  ;;  %p430_p9 = scmp.lt.s32.totalorder %s428_s15, %s421_s7 }
  0x21   : > { %p425_p11 = pneg %p424_p6  ;;  %p431_p10 = por %p430_p9, %p429_p13 }
  0x23   : > { %p432_p1 = pnand %p431_p10, %p425_p11 }
  0x25   : > { %435 = shalt.err (!%p432_p1)
}
  0x26   : > { %361 = dma.hbm_to_vmem [thread:$0]  (!%p607_p8), %s601_s24, 128, %s605_s26, %s111_s28  }
  0x27   : > { %p718_p0 = scmp.lt.s32.totalorder %s530_s12, 3  ;;  %p719_p2 = scmp.ge.s32.totalorder %s530_s12, 1 }
  0x28   : > { %s651_s25 = scalar_lea.hbm %s713_s1, %s336_s21  ;;  %s132_s29 = scalar_lea.vmem [#allocation6], %s335_s20 }
  0x29   : > { %p642_p3 = pnand %p719_p2, %p718_p0  ;;  %s139_s30 = sshll.u32 %s132_s29, 4  ;;  %s140_s30 = int_to_ptr.vmem [resolvable:$true] %s139_s30 }
  0x2a   : > { %s129_s24 = scalar_lea.sflag [#allocation7], %s592_s19  ;;  %s436_s26 = scalar_lea.hbm %s651_s25, 128 }
  0x2b   : > { %s720_s16 = scalar_select %p642_p3, 1, 0 }
  0x2c   : > { %p437_p9 = scmp.ne.s32.totalorder %s651_s25, %s436_s26  ;;  %s441_s3 = scalar_lea.hbm %s713_s1, 256 }
  0x2d   : > { %p442_p5 = scmp.lt.s32.totalorder %s651_s25, %s713_s1  ;;  %p443_p6 = scmp.lt.s32.totalorder %s441_s3, %s436_s26 }
  0x2e   : > { %p439_p10 = pnand %p437_p9, %p410_p12 }
  0x2f   : > { %p444_p11 = por %p443_p6, %p442_p5 }
  0x30   : > { %p440_p4 = pneg %p439_p10 }
  0x32   : > { %p445_p13 = pnand %p444_p11, %p440_p4 }
  0x34   : > { %448 = shalt.err (!%p445_p13)
}
  0x35   : > { %s449_s20 = scalar_lea.vmem %s140_s30, 128  ;;  %s533_s19 = smov [#allocation6]  }
  0x36   : > { %p450_p1 = scmp.ne.s32.totalorder %s140_s30, %s449_s20  ;;  %s454_s5 = sshll.u32 %s533_s19, 4  ;;  %s455_s5 = int_to_ptr.vmem [resolvable:$false] %s454_s5 }
  0x37   : > { %s456_s6 = scalar_lea.vmem %s455_s5, 256  ;;  %p457_p9 = scmp.lt.s32.totalorder %s140_s30, %s455_s5 }
  0x38   : > { %p452_p0 = pnand %p450_p1, %p410_p12  ;;  %p458_p10 = scmp.lt.s32.totalorder %s456_s6, %s449_s20 }
  0x3a   : > { %p453_p2 = pneg %p452_p0  ;;  %p459_p7 = por %p458_p10, %p457_p9 }
  0x3c   : > { %p460_p3 = pnand %p459_p7, %p453_p2 }
  0x3e   : > { %463 = shalt.err (!%p460_p3)
}
  0x3f   : > { %364 = dma.hbm_to_vmem [thread:$0]  (!%p607_p8), %s651_s25, 128, %s140_s30, %s129_s24  }
  0x40   : > { %p721_p4 = scmp.ne.s32.totalorder %s720_s16, 0 }
  0x41   : > { %s150_s7 = sand.u32 (!%p721_p4), 1, %s522_s10   ;;  %p722_p12 = scmp.ne.s32.totalorder (!%p721_p4), %s716_s18, 0 }
  0x42   : > { %148 = sbr.rel (%p721_p4) target bundleno = 367 (0x16f), region = 28  ;;  %s340_s8 = sshll.u32 (!%p721_p4), %s150_s7, 3 }
  0x43   : > { %s151_s9 = scalar_lea.sflag (!%p721_p4), [#allocation4], %s150_s7  ;;  %s154_s15 = scalar_lea.vmem (!%p721_p4), [#allocation3], %s340_s8 }
  0x47   : > { %505 = dma.done.wait (%p722_p12), %s151_s9, 128  }
  0x48   : > { %507 = vsyncadd (%p722_p12), %s151_s9, 4294967168  ;;  %s160_s22 = scalar_lea.sflag [#allocation7], %s150_s7  ;;  %s163_s23 = scalar_lea.vmem [#allocation6], %s340_s8 }
  0x49   : > { %509 = dma.done.wait (%p722_p12), %s160_s22, 128  }
  0x4a   : > { %511 = vsyncadd (%p722_p12), %s160_s22, 4294967168  ;;  %p342_p7 = scmp.ne.s32.totalorder %s570_s13, 0 }
  0x4c   : > { %187 = sbr.rel (%p342_p7) target bundleno = 83 (0x53), region = 40 }
  0x51   : > { %vm188_vm0 = vcmask 0   ;;  %v534_v0 = vmov 0.0  }
  0x52   : > { %189 = vst.msk [vmem:[#allocation2] sm:$0x1] %vm188_vm0, %v534_v0 }
  0x53 PF: > { %v190_v1 = vld [vmem:[%s154_s15] sm:$0xff]  ;;  %v191_v10 = vld [vmem:[%s163_s23] sm:$0xff]  ;;  %vm243_vm2 = vcmask 0   ;;  %p343_p8 = scmp.ne.s32.totalorder %s570_s13, 1 }
  0x54   : > { %v192_v2 = vsub.f32 0.0, %v190_v1  ;;  %v216_v16 = vsub.f32 1.0, %v191_v10  ;;  %v224_v21 = vmul.f32 0.25, %v191_v10 }
  0x56   : > { %v193_v3 = vmul.f32 1.442695, %v192_v2  ;;  %v225_v25 = vmul.f32 0.75, %v216_v16 }
  0x58   : > { %402 = vpow2.f32 %v193_v3  ;;  %v226_v31 = vadd.f32 %v225_v25, %v224_v21 }
  0x59   : > { %v231_v46 = vld [vmem:[#allocation2] sm:$0x1] }
  0x65   : > { %v403_v4 = vpop.eup %402 }
  0x66   : > { %v195_v5 = vadd.f32 1.0, %v403_v4  ;;  %v201_v6 = vmul.f32 -0.5, %v403_v4  ;;  %v204_v8 = vand.u32 2147483647, %v403_v4 }
  0x68   : > { %404 = vrcp.f32 %v195_v5  ;;  %v202_v7 = vadd.f32 1.0, %v201_v6  ;;  %vm205_vm1 = vcmp.lt.f32.partialorder %v204_v8, 0.0004427343 }
  0x69   : > { %406 = vlog2.f32 %v195_v5 }
  0x6a   : > { %v203_v11 = vmul.f32 %v403_v4, %v202_v7 }
  0x75   : > { %v405_v9 = vpop.eup %404 }
  0x76   : > { %v407_v12 = vpop.eup %406  ;;  %v213_v13 = vmax.f32 %v405_v9, 1e-08 }
  0x77   : > { %v200_v14 = vmul.f32 0.6931472, %v407_v12 }
  0x78   : > { %v214_v15 = vmin.f32 %v213_v13, 1.0 }
  0x79   : > { %v206_v17 = vsel %vm205_vm1, %v203_v11, %v200_v14 }
  0x7a   : > { %v207_v18 = vsub.f32 0.0, %v206_v17  ;;  %v220_v19 = vmul.f32 %v214_v15, %v191_v10  ;;  %v221_v20 = vsub.f32 1.0, %v214_v15 }
  0x7c   : > { %v208_v22 = vsub.f32 %v207_v18, %v190_v1  ;;  %v209_v23 = vmax.f32 %v207_v18, -18.420681  ;;  %v222_v24 = vmul.f32 %v221_v20, %v216_v16 }
  0x7e   : > { %v210_v26 = vmin.f32 %v209_v23, -1e-08  ;;  %v211_v27 = vmax.f32 %v208_v22, -18.420681  ;;  %v223_v28 = vadd.f32 %v222_v24, %v220_v19 }
  0x80   : > { %v212_v29 = vmin.f32 %v211_v27, -1e-08  ;;  %v215_v30 = vmul.f32 %v210_v26, %v191_v10  ;;  %v227_v32 = vsub.f32 1.0, %v223_v28 }
  0x82   : > { %v217_v33 = vmul.f32 %v216_v16, %v212_v29  ;;  %v228_v34 = vmul.f32 %v227_v32, %v227_v32 }
  0x84   : > { %v218_v35 = vadd.f32 %v217_v33, %v215_v30  ;;  %v229_v36 = vmul.f32 %v228_v34, %v226_v31 }
  0x86   : > { %v219_v37 = vsub.f32 0.0, %v218_v35 }
  0x88   : > { %v230_v38 = vmul.f32 %v229_v36, %v219_v37 }
  0x8a   : > { %232 = vadd.xlane.f32.xlu0 %v230_v38 }
 0x113   : > { %v233_v39 = vpop.xlane.xlu0 %232 }
 0x114   : > { %v234_v40 = vrot.slane %v233_v39, 4 }
 0x116   : > { %v235_v41 = vadd.f32 %v234_v40, %v233_v39 }
 0x118   : > { %v236_v42 = vrot.slane %v235_v41, 2 }
 0x11a   : > { %v237_v43 = vadd.f32 %v236_v42, %v235_v41 }
 0x11c   : > { %v238_v44 = vrot.slane %v237_v43, 1 }
 0x11e   : > { %v239_v45 = vadd.f32 %v238_v44, %v237_v43 }
 0x120   : > { %348 = vpush %v239_v45 }
 0x151   : > { %s349_s18 = spop %348  ;;  %248 = sbr.rel (%p343_p8) target bundleno = 352 (0x160), region = 44 }
 0x152   : > { %v241_v47 = vstv %s349_s18 }
 0x153   : > { %v242_v48 = vadd.f32 %v241_v47, %v231_v46 }
 0x155   : > { %244 = vst.msk [vmem:[#allocation2] sm:$0x1] %vm243_vm2, %v242_v48 }
 0x15c   : > { %v249_v49 = vld [vmem:[#allocation2] sm:$0x1] }
 0x15d   : > { %v250_v50 = vmul.f32 0.0625, %v249_v49 }
 0x15f   : > { %251 = vst.msk [vmem:[#allocation8] sm:$0x1] %vm243_vm2, %v250_v50 }
 0x160 PF: > { %p366_p3 = scmp.eq.s32.totalorder %s570_s13, 1  ;;  %s535_s27 = smov [#allocation8]  }
 0x161   : > { %s259_s16 = sshll.u32 %s535_s27, 4  ;;  %s260_s16 = int_to_ptr.vmem [resolvable:$true] %s259_s16 }
 0x162   : > { %s464_s25 = scalar_lea.vmem %s260_s16, 16  ;;  %s470_s29 = scalar_lea.vmem %s260_s16, 32 }
 0x163   : > { %p465_p5 = scmp.ne.s32.totalorder %s260_s16, %s464_s25  ;;  %p471_p13 = scmp.lt.s32.totalorder %s260_s16, %s260_s16 }
 0x164   : > { %p472_p1 = scmp.lt.s32.totalorder %s470_s29, %s464_s25 }
 0x165   : > { %p466_p6 = pnand %p465_p5, %p366_p3 }
 0x166   : > { %p473_p0 = por %p472_p1, %p471_p13 }
 0x167   : > { %p467_p11 = pneg %p466_p6 }
 0x169   : > { %p474_p2 = pnand %p473_p0, %p467_p11 }
 0x16b   : > { %477 = shalt.err (!%p474_p2)
}
 0x16c   : > { %355 = dma.vmem_to_hbm [thread:$0]  (%p366_p3), %s260_s16, 16, %s714_s2, [#allocation5]  }
 0x16d   : > { %513 = dma.done.wait (%p366_p3), [#allocation5], 16  }
 0x16e   : > { %515 = vsyncadd (%p366_p3), [#allocation5], 4294967280 }
 0x16f PF: > { %p16_p9 = scmp.ge.s32.totalorder %s573_s14, 4   ;;  %s723_s9 = smov %s522_s10 }
 0x170   : > { %s724_s10 = smov %s526_s11  ;;  %s725_s11 = smov %s583_s17 }
 0x171   : > { %s726_s12 = smov %s573_s14  ;;  %18 = sbr.rel (!%p16_p9) target bundleno = 6 (0x6), region = 86 }
 0x176   :  { %272 = vsyncpa [#allocation4], 1 }
 0x177   :  { %274 = vsyncpa [#allocation4 + $0x1], 1 }
 0x178   :  { %275 = vsyncpa [#allocation7], 1 }
 0x179   :  { %277 = vsyncpa [#allocation7 + $0x1], 1 }
 0x17a   :  { %278 = vsyncpa [#allocation5], 1 }
 0x17b   :  { %280 = vsyncpa [#allocation5 + $0x1], 1 }

</bundles_post_ra>
